<compile_context>
chip_gen: v5e
topology: v5e:2x2
jax: 0.10.0
libtpu: 0.0.40
codegen_flags: <defaults>
</compile_context>

<pallas_src>
import jax
import jax.numpy as jnp
from jax.experimental import pallas as pl
from jax.experimental.pallas import tpu as pltpu


# ----------------------------------------------------------------------------
# Glow-style squeeze / unsqueeze (NCHW), pure JAX glue.
# Only used for resqueeze != 2 (the resqueeze == 2 path is an exact identity).
# TODO(synk): for general resqueeze these permutations could be folded into the
# kernel's BlockSpec/index_map with in-VMEM reshuffles; kept as JAX glue here.
# ----------------------------------------------------------------------------
def squeeze2d(x, factor):
    if factor == 1:
        return x
    B, C, H, W = x.shape
    assert H % factor == 0 and W % factor == 0
    x = x.reshape(B, C, H // factor, factor, W // factor, factor)
    x = jnp.transpose(x, (0, 1, 3, 5, 2, 4))
    return x.reshape(B, C * factor * factor, H // factor, W // factor)


def unsqueeze2d(x, factor):
    if factor == 1:
        return x
    B, C, H, W = x.shape
    f2 = factor * factor
    assert C % f2 == 0
    x = x.reshape(B, C // f2, factor, factor, H, W)
    x = jnp.transpose(x, (0, 1, 4, 2, 5, 3))
    return x.reshape(B, C // f2, H * factor, W * factor)


# ----------------------------------------------------------------------------
# Pallas kernel: 1x1 conv in NCHW layout.
#   x block: (bb, K, tp) — channels on sublanes, pixels on the 128-lane axis
#   w      : (K, K)
#   y block: (bb, K, tp),  y[b] = W @ x[b]   (MXU, f32 accumulation)
# bb is a small static batch-packing factor, unrolled in Python.
# ----------------------------------------------------------------------------
def _conv1x1_kernel(x_ref, w_ref, o_ref):
    w = w_ref[...]
    for b in range(x_ref.shape[0]):  # static, small (batch items packed per step)
        o_ref[b] = jnp.dot(
            w, x_ref[b], preferred_element_type=jnp.float32
        ).astype(o_ref.dtype)


def _pick_tiles(B, K, P, itemsize):
    """Choose (bb, tp): batch items per block and pixel-tile size.

    VMEM live set is the double-buffered input + output blocks:
        4 * bb * K * tp * itemsize bytes
    kept under ~12 MiB so it fits v5e's 16 MiB scoped-VMEM default (v6e/v7x
    have 32 MiB scoped) without needing vmem_limit_bytes.  Each grid step
    targets >= ~2 MiB of input so the ~0.35 us per-step overhead is hidden
    behind DMA time on this memory-bound kernel.
    """
    LANE = 128
    VMEM_BUDGET = 12 * 1024 * 1024
    TARGET_STEP_BYTES = 2 * 1024 * 1024
    TP_CAP = 16384  # lane-dense cap, multiple of 128

    # --- pixel tile: lane-dense multiple of 128 whenever P allows it ---
    if P <= LANE:
        # TODO(synk): lane-sparse (<128) masked stores; a layout change folding
        # several rows into the lane axis would be needed to avoid them.
        tp = P
    else:
        tp = min(TP_CAP, (P // LANE) * LANE)  # ragged tail block masked by Pallas
        max_tp = (VMEM_BUDGET // (4 * K * itemsize)) // LANE * LANE
        tp = max(LANE, min(tp, max_tp))

    # --- batch packing: grow bb (a divisor of B) until a step is big enough ---
    bb = 1
    per_batch_bytes = K * tp * itemsize
    if per_batch_bytes < TARGET_STEP_BYTES:
        for cand in range(2, B + 1):
            if B % cand:
                continue
            if 4 * cand * per_batch_bytes > VMEM_BUDGET:
                break
            bb = cand
            if cand * per_batch_bytes >= TARGET_STEP_BYTES:
                break
    return bb, tp


def conv1x1_pallas(z3, w):
    """y[b, o, p] = sum_i w[o, i] * z3[b, i, p]   for z3 of shape (B, K, P)."""
    B, K, P = z3.shape
    # Note: block dim K equals the full channel extent, so it is always legal;
    # K % 8 != 0 (f32) merely sublane-pads DMAs (not hit for typical configs).
    bb, tp = _pick_tiles(B, K, P, z3.dtype.itemsize)
    grid = (B // bb, pl.cdiv(P, tp))

    return pl.pallas_call(
        _conv1x1_kernel,
        out_shape=jax.ShapeDtypeStruct((B, K, P), z3.dtype),
        grid_spec=pltpu.PrefetchScalarGridSpec(
            num_scalar_prefetch=0,
            grid=grid,
            in_specs=[
                pl.BlockSpec((bb, K, tp), lambda i, j: (i, 0, j)),
                pl.BlockSpec((K, K), lambda i, j: (0, 0)),
            ],
            out_specs=pl.BlockSpec((bb, K, tp), lambda i, j: (i, 0, j)),
        ),
        compiler_params=pltpu.CompilerParams(
            dimension_semantics=("parallel", "parallel"),
        ),
    )(z3, w)


# ----------------------------------------------------------------------------
# Module-equivalent forward.  `resqueeze` and `reverse` must be static.
# ----------------------------------------------------------------------------
def invertible_conv1x1_resqueeze_forward(
    x, weight, logdet=None, *, resqueeze, reverse=False
):
    B, C, H, W = x.shape
    K = weight.shape[0]

    if resqueeze == 2:
        # unsqueeze2d(., 2) followed by squeeze2d(., 2) is the identity, so the
        # resqueeze plumbing cancels exactly (K == C here).  Run the 1x1 conv
        # directly on x viewed as (B, C, H*W): a free reshape, zero transposes.
        assert K == C, "resqueeze==2 implies K == num_channels"
        H2, W2 = H, W
        pixels = H * W
        z3 = x.reshape(B, K, pixels)
    else:
        z = squeeze2d(unsqueeze2d(x, 2), resqueeze)
        _, Kz, H2, W2 = z.shape
        assert Kz == K
        pixels = H2 * W2
        z3 = z.reshape(B, K, pixels)

    # --- log-determinant term ---
    # TODO(synk): slogdet / matrix inverse (LU factorization) have no clean
    # Pallas equivalent; computed with jnp.linalg outside the kernel.
    _, logabsdet = jnp.linalg.slogdet(weight)
    dlogdet = logabsdet * pixels

    if reverse:
        # TODO(synk): PyTorch inverts in float64; JAX default x32 -> f32 inverse.
        w_use = jnp.linalg.inv(weight)
    else:
        w_use = weight

    # --- 1x1 conv hot path in Pallas, native NCHW layout ---
    y3 = conv1x1_pallas(z3, w_use)

    if resqueeze == 2:
        y = y3.reshape(B, C, H, W)
    else:
        y = y3.reshape(B, K, H2, W2)
        y = squeeze2d(unsqueeze2d(y, resqueeze), 2)

    if logdet is not None:
        logdet = logdet + dlogdet if not reverse else logdet - dlogdet
    return y, logdet


# ----------------------------------------------------------------------------
# Demo / self-check
# ----------------------------------------------------------------------------
if __name__ == "__main__":
    key = jax.random.PRNGKey(0)
    k_w, k_x, k_w2 = jax.random.split(key, 3)

    num_channels = 16
    B, H, W = 2, 16, 16
    x = jax.random.normal(k_x, (B, num_channels, H, W), dtype=jnp.float32)
    logdet0 = jnp.zeros((B,), dtype=jnp.float32)

    fwd = jax.jit(
        invertible_conv1x1_resqueeze_forward,
        static_argnames=("resqueeze", "reverse"),
    )

    def reference_forward(xr, wr, ld0, r):
        zr = squeeze2d(unsqueeze2d(xr, 2), r)
        pix = zr.shape[2] * zr.shape[3]
        zr = jnp.einsum("oi,bihw->bohw", wr, zr)
        zr = squeeze2d(unsqueeze2d(zr, r), 2)
        return zr, ld0 + jnp.linalg.slogdet(wr)[1] * pix

    # ---- resqueeze = 2 (fast identity-glue path), forward + reverse ----
    resqueeze = 2
    K = num_channels // (2 ** 2) * (resqueeze ** 2)  # = 16, as in module __init__
    weight = jnp.linalg.qr(
        jax.random.normal(k_w, (K, K), dtype=jnp.float32)
    )[0].astype(jnp.float32)

    z, logdet = fwd(x, weight, logdet0, resqueeze=resqueeze, reverse=False)
    jax.block_until_ready((z, logdet))

    z_ref, logdet_ref = reference_forward(x, weight, logdet0, resqueeze)
    assert z.shape == x.shape and z.dtype == x.dtype
    assert jnp.allclose(z, z_ref, atol=1e-5, rtol=1e-5), "forward mismatch (r=2)"
    assert jnp.allclose(logdet, logdet_ref, atol=1e-4, rtol=1e-5), "logdet mismatch"

    x_rec, logdet_rt = fwd(z, weight, logdet, resqueeze=resqueeze, reverse=True)
    jax.block_until_ready((x_rec, logdet_rt))
    assert jnp.allclose(x_rec, x, atol=1e-4, rtol=1e-4), "reverse roundtrip mismatch"
    assert jnp.allclose(logdet_rt, logdet0, atol=1e-3, rtol=1e-4), "logdet roundtrip"

    # ---- resqueeze = 4 (general glue path, small-P batch-packed kernel) ----
    resqueeze2 = 4
    K2 = num_channels // (2 ** 2) * (resqueeze2 ** 2)  # = 64
    weight2 = jnp.linalg.qr(
        jax.random.normal(k_w2, (K2, K2), dtype=jnp.float32)
    )[0].astype(jnp.float32)

    z2, logdet2 = fwd(x, weight2, logdet0, resqueeze=resqueeze2, reverse=False)
    jax.block_until_ready((z2, logdet2))
    z2_ref, logdet2_ref = reference_forward(x, weight2, logdet0, resqueeze2)
    assert jnp.allclose(z2, z2_ref, atol=1e-5, rtol=1e-5), "forward mismatch (r=4)"
    assert jnp.allclose(logdet2, logdet2_ref, atol=1e-4, rtol=1e-5), "logdet mismatch (r=4)"

    print("KERNEL_OK")
</pallas_src>

<mosaic_0001>
module attributes {stable_mosaic.version = 11 : i64} {
  func.func @_conv1x1_kernel(%arg0: i32, %arg1: i32, %arg2: memref<2x16x256xf32, #tpu.memory_space<vmem>>, %arg3: memref<16x16xf32, #tpu.memory_space<vmem>>, %arg4: memref<2x16x256xf32, #tpu.memory_space<vmem>>) attributes {dimension_semantics = [#tpu.dimension_semantics<parallel>, #tpu.dimension_semantics<parallel>], iteration_bounds = array<i64: 1, 1>, scalar_prefetch = 0 : i64, scratch_operands = 0 : i64, tpu.core_type = #tpu.core_type<tc>, window_params = [{transform_indices = @transform_0, window_bounds = array<i64: 2, 16, 256>}, {pipeline_mode = #tpu.pipeline_mode<synchronous>, transform_indices = @transform_1, window_bounds = array<i64: 16, 16>}, {transform_indices = @transform_2, window_bounds = array<i64: 2, 16, 256>}]} {
    %c0 = arith.constant 0 : index
    %c0_0 = arith.constant 0 : index
    %0 = vector.load %arg3[%c0, %c0_0] : memref<16x16xf32, #tpu.memory_space<vmem>>, vector<16x16xf32>
    %c0_1 = arith.constant 0 : index
    %c0_2 = arith.constant 0 : index
    %c0_3 = arith.constant 0 : index
    %1 = vector.load %arg2[%c0_1, %c0_2, %c0_3] : memref<2x16x256xf32, #tpu.memory_space<vmem>>, vector<1x16x256xf32>
    %2 = vector.shape_cast %1 : vector<1x16x256xf32> to vector<16x256xf32>
    %cst = arith.constant dense<0.000000e+00> : vector<16x256xf32>
    %3 = tpu.matmul %0, %2, %cst {dimension_numbers = #tpu.dot_dimension_numbers<[1], [0], [0], [1], [0, 0, 1, 1], [], []>} : vector<16x16xf32>, vector<16x256xf32>, vector<16x256xf32> -> vector<16x256xf32>
    %c0_4 = arith.constant 0 : index
    %c0_5 = arith.constant 0 : index
    %c0_6 = arith.constant 0 : index
    %4 = vector.load %arg4[%c0_4, %c0_5, %c0_6] : memref<2x16x256xf32, #tpu.memory_space<vmem>>, vector<1x16x256xf32>
    %5 = vector.shape_cast %4 : vector<1x16x256xf32> to vector<16x256xf32>
    %6 = vector.shape_cast %3 : vector<16x256xf32> to vector<1x16x256xf32>
    tpu.vector_store %arg4[%c0_4, %c0_5, %c0_6], %6 {strides = array<i32>} : memref<2x16x256xf32, #tpu.memory_space<vmem>>, vector<1x16x256xf32>,
    %c1 = arith.constant 1 : index
    %c0_7 = arith.constant 0 : index
    %c0_8 = arith.constant 0 : index
    %7 = vector.load %arg2[%c1, %c0_7, %c0_8] : memref<2x16x256xf32, #tpu.memory_space<vmem>>, vector<1x16x256xf32>
    %8 = vector.shape_cast %7 : vector<1x16x256xf32> to vector<16x256xf32>
    %cst_9 = arith.constant dense<0.000000e+00> : vector<16x256xf32>
    %9 = tpu.matmul %0, %8, %cst_9 {dimension_numbers = #tpu.dot_dimension_numbers<[1], [0], [0], [1], [0, 0, 1, 1], [], []>} : vector<16x16xf32>, vector<16x256xf32>, vector<16x256xf32> -> vector<16x256xf32>
    %c1_10 = arith.constant 1 : index
    %c0_11 = arith.constant 0 : index
    %c0_12 = arith.constant 0 : index
    %10 = vector.load %arg4[%c1_10, %c0_11, %c0_12] : memref<2x16x256xf32, #tpu.memory_space<vmem>>, vector<1x16x256xf32>
    %11 = vector.shape_cast %10 : vector<1x16x256xf32> to vector<16x256xf32>
    %12 = vector.shape_cast %9 : vector<16x256xf32> to vector<1x16x256xf32>
    tpu.vector_store %arg4[%c1_10, %c0_11, %c0_12], %12 {strides = array<i32>} : memref<2x16x256xf32, #tpu.memory_space<vmem>>, vector<1x16x256xf32>,
    return
  }
  func.func @transform_0(%arg0: i32, %arg1: i32) -> (i32, i32, i32) {
    %c0_i32 = arith.constant 0 : i32
    %c0_i32_0 = arith.constant 0 : i32
    return %arg0, %c0_i32, %arg1 : i32, i32, i32
  }
  func.func @transform_1(%arg0: i32, %arg1: i32) -> (i32, i32) {
    %c0_i32 = arith.constant 0 : i32
    %c0_i32_0 = arith.constant 0 : i32
    %c0_i32_1 = arith.constant 0 : i32
    return %c0_i32, %c0_i32_0 : i32, i32
  }
  func.func @transform_2(%arg0: i32, %arg1: i32) -> (i32, i32, i32) {
    %c0_i32 = arith.constant 0 : i32
    %c0_i32_0 = arith.constant 0 : i32
    return %arg0, %c0_i32, %arg1 : i32, i32, i32
  }
}

</mosaic_0001>

<bundles_post_ra>
// kernel: custom-call.2
= control target key start
LH: loop header
LB: loop body
LE: loop exit
PB: predicated region body
PF: predicated region fallthrough
CT: control target
= control target key end

     0   :  { %5 = vsyncpa [#allocation4], 0  ;;  %s848_s0 = inlined_call_operand.vmem [shape: f32[16,16], index: 0, kind: input, shape index: {}]   ;;  %s849_s1 = inlined_call_operand.vmem [shape: f32[16,16], index: 1, kind: output, shape index: {0}]   ;;  %s850_s2 = inlined_call_operand.hbm [shape: s32[16], index: 2, kind: output, shape index: {1}]   ;;  %s851_s3 = inlined_call_operand.hbm [shape: s32[16], index: 3, kind: output, shape index: {2}]  }
   0x1   :  { %6 = vsyncpa [#allocation7], 0  ;;  %s16_s14 = scalar_lea.vmem %s848_s0, 8 }
   0x2   :  { %p421_p0 = scmp.gt.s32.totalorder %s848_s0, %s16_s14 }
   0x3   :  { %s720_s17 = smov (!%p421_p0), [#allocation0]   ;;  %s724_s20 = smov (!%p421_p0), %s848_s0  }
   0x4   :  { %422 = sbr.rel (%p421_p0) target bundleno = 17 (0x11), region = 128 }
   0x9 LB: > { %v50_v0 = vld [vmem:[%s726_s20] sm:$0xff]  ;;  %s52_s20 = scalar_lea.vmem %s726_s20, 8   ;;  %s726_s20 = sphi %s724_s20, %s52_s20   ;;  %s722_s17 = sphi %s720_s17, %s53_s17  }
   0xa   : > { %51 = vst [vmem:[%s722_s17] sm:$0xff] %v50_v0  ;;  %s53_s17 = scalar_lea.vmem %s722_s17, 8   ;;  %p47_p1 = scmp.gt.s32.totalorder %s52_s20, %s16_s14 }
   0xc   :  { %49 = sbr.rel (!%p47_p1) target bundleno = 9 (0x9), region = 134 }
  0x11 PF:  { %v63_v1 = vld [vmem:[#allocation0] sm:$0xff]  ;;  %v67_v2 = vld [vmem:[#allocation0 + $0x8] sm:$0xff]  ;;  %v70_v3 = vlaneseq  ;;  %v744_v5 = vmov 0   ;;  %s728_s0 = smov 0  }
  0x12   :  { %64 = vst [vmem:[#allocation1] sm:$0xff] %v63_v1 }
  0x13   :  { %68 = vst [vmem:[#allocation1 + $0x8] sm:$0xff] %v67_v2  ;;  %v777_v4 = vshrl.u32 %v70_v3, 7 }
  0x14   :  { %69 = vst [vmem:[#allocation2] sm:$0x1] %v744_v5 }
  0x15 LB: > { %s459_s21 = sshll.u32 %s730_s0, 3  ;;  %s78_s0 = sadd.s32 1, %s730_s0   ;;  %s730_s0 = sphi %s728_s0, %s78_s0  }
  0x16   : > { %v82_v6 = vstv %s459_s21  ;;  %s80_s22 = scalar_lea.vmem [#allocation8], %s459_s21  ;;  %p75_p2 = scmp.ge.s32.totalorder %s78_s0, 2  }
  0x17   : > { %v83_v7 = vadd.s32 %v82_v6, %v777_v4  ;;  %s780_s23 = smov (%p75_p2), 0  }
  0x18   :  { %77 = sbr.rel (!%p75_p2) target bundleno = 21 (0x15), region = 145 }
  0x19   : > { %84 = vst [vmem:[%s80_s22] sm:$0xff] %v83_v7 }
  0x1d LB: > { %v95_v8 = vld [vmem:[#allocation1] sm:$0xff]  ;;  %v107_v9 = vld [vmem:[#allocation1 + $0x8] sm:$0xff]  ;;  %v786_v10 = vadd.s32 8, %v777_v4  ;;  %v789_v12 = vstv %s734_s23  ;;  %s153_s24 = ssub.s32 128, %s734_s23  ;;  %v800_v46 = vand.u32 127, %v70_v3  ;;  %s165_s26 = scalar_lea.vmem [#allocation1], %s734_s23  ;;  %s734_s23 = sphi %s780_s23, %s90_s23  }
  0x1e   : > { %v96_v11 = vand.u32 2147483647, %v95_v8  ;;  %v108_v13 = vand.u32 2147483647, %v107_v9  ;;  %vm99_vm0 = vcmp.ge.s32.totalorder %v777_v4, %v789_v12  ;;  %v162_v47 = vld [vmem:[#allocation2] ss:$0 sm:$0xff] }
  0x1f   : > { %vm111_vm3 = vcmp.ge.s32.totalorder %v786_v10, %v789_v12  ;;  %vm160_vm13 = vcmp.eq.s32.totalorder %v800_v46, %v789_v12  ;;  %v167_v48 = vld [vmem:[%s165_s26] ss:$0 sm:$0xff]  ;;  %s171_s28 = scalar_lea.vmem [#allocation8], %s734_s23  ;;  %vm219_vm15 = vcmp.gt.s32.totalorder %v786_v10, %v789_v12  ;;  %s90_s23 = sadd.s32 1, %s734_s23  }
  0x20   : > { %vm461_vm1 = vcmp.gt.f32.partialorder %v96_v11, -inf  ;;  %v173_v52 = vld [vmem:[%s171_s28] ss:$0 sm:$0xff]  ;;  %p87_p3 = scmp.ge.s32.totalorder %s90_s23, 16  }
  0x21   : > { %vm103_vm2 = vmand %vm99_vm0, %vm461_vm1  ;;  %vm191_vm0 = vcmp.gt.s32.totalorder %v777_v4, %v789_v12  ;;  %s736_s5 = smov (%p87_p3), %s849_s1   ;;  %s740_s6 = smov (%p87_p3), [#allocation1]  }
  0x22   : > { %v104_v14 = vsel %vm103_vm2, %v777_v4, %v789_v12  ;;  %v105_v15 = vsel %vm103_vm2, %v96_v11, -inf }
  0x23   : > { %vm114_vm4 = vcmp.lt.f32.partialorder %v105_v15, %v108_v13 }
  0x24   : > { %vm115_vm5 = vmand %vm111_vm3, %vm114_vm4 }
  0x25   : > { %v116_v16 = vsel %vm115_vm5, %v786_v10, %v104_v14  ;;  %v117_v17 = vsel %vm115_vm5, %v108_v13, %v105_v15 }
  0x26   : > { %v118_v18 = vrot.slane %v117_v17, 1  ;;  %v119_v19 = vrot.slane %v116_v16, 1 }
  0x28   : > { %vm120_vm6 = vcmp.ge.f32.partialorder %v118_v18, %v117_v17  ;;  %v123_v20 = vrot.slane %v118_v18, 1  ;;  %v124_v21 = vrot.slane %v119_v19, 1 }
  0x29   : > { %v121_v22 = vsel %vm120_vm6, %v118_v18, %v117_v17  ;;  %v122_v23 = vsel %vm120_vm6, %v119_v19, %v116_v16 }
  0x2a   : > { %vm125_vm7 = vcmp.ge.f32.partialorder %v123_v20, %v121_v22  ;;  %v128_v24 = vrot.slane %v123_v20, 1  ;;  %v129_v25 = vrot.slane %v124_v21, 1 }
  0x2b   : > { %v126_v26 = vsel %vm125_vm7, %v123_v20, %v121_v22  ;;  %v127_v27 = vsel %vm125_vm7, %v124_v21, %v122_v23 }
  0x2c   : > { %vm130_vm8 = vcmp.ge.f32.partialorder %v128_v24, %v126_v26  ;;  %v133_v28 = vrot.slane %v128_v24, 1  ;;  %v134_v29 = vrot.slane %v129_v25, 1 }
  0x2d   : > { %v131_v30 = vsel %vm130_vm8, %v128_v24, %v126_v26  ;;  %v132_v31 = vsel %vm130_vm8, %v129_v25, %v127_v27 }
  0x2e   : > { %vm135_vm9 = vcmp.ge.f32.partialorder %v133_v28, %v131_v30  ;;  %v138_v32 = vrot.slane %v133_v28, 1  ;;  %v139_v33 = vrot.slane %v134_v29, 1 }
  0x2f   : > { %v136_v34 = vsel %vm135_vm9, %v133_v28, %v131_v30  ;;  %v137_v35 = vsel %vm135_vm9, %v134_v29, %v132_v31  ;;  %vm236_vm9 = vmand %vm219_vm15, %vm160_vm13 }
  0x30   : > { %vm140_vm10 = vcmp.ge.f32.partialorder %v138_v32, %v136_v34  ;;  %v143_v36 = vrot.slane %v138_v32, 1  ;;  %v144_v37 = vrot.slane %v139_v33, 1 }
  0x31   : > { %v141_v38 = vsel %vm140_vm10, %v138_v32, %v136_v34  ;;  %v142_v39 = vsel %vm140_vm10, %v139_v33, %v137_v35 }
  0x32   : > { %vm145_vm11 = vcmp.ge.f32.partialorder %v143_v36, %v141_v38  ;;  %v148_v40 = vrot.slane %v143_v36, 1  ;;  %v149_v41 = vrot.slane %v144_v37, 1 }
  0x33   : > { %v146_v42 = vsel %vm145_vm11, %v143_v36, %v141_v38  ;;  %v147_v43 = vsel %vm145_vm11, %v144_v37, %v142_v39  ;;  %vm208_vm11 = vmand %vm191_vm0, %vm160_vm13 }
  0x34   : > { %vm150_vm12 = vcmp.ge.f32.partialorder %v148_v40, %v146_v42 }
  0x35   : > { %v152_v44 = vsel %vm150_vm12, %v149_v41, %v147_v43  ;;  %vm183_vm12 = vcmp.gt.s32.totalorder %v800_v46, %v789_v12 }
  0x36   : > { %154 = vrot.lane.b32.xlu0 %v152_v44, %s153_s24 }
  0xa8   : > { %v155_v45 = vpop.permute.xlu0 %154 }
  0xa9   : > { %466 = vpush %v155_v45 }
  0xda   : > { %s467_s25 = spop %466 }
  0xdb   : > { %v161_v49 = vstv %s467_s25  ;;  %s166_s27 = scalar_lea.vmem [#allocation1], %s467_s25  ;;  %s172_s29 = scalar_lea.vmem [#allocation8], %s467_s25 }
  0xdc   : > { %v163_v50 = vsel %vm160_vm13, %v161_v49, %v162_v47  ;;  %v168_v51 = vld [vmem:[%s166_s27] ss:$0 sm:$0xff] }
  0xdd   : > { %164 = vst [vmem:[#allocation2] sm:$0x1] %v163_v50  ;;  %v174_v53 = vld [vmem:[%s172_s29] ss:$0 sm:$0xff]  ;;  %vm177_vm14 = vcmp.ne.f32.partialorder %v168_v51, 0.0  ;;  %v184_v10 = vsel %vm183_vm12, %v168_v51, 0.0 }
  0xde   : > { %169 = vst [vmem:[%s166_s27] sm:$0x1] %v167_v48  ;;  %vm178_vm1 = vmand %vm160_vm13, %vm177_vm14 }
  0xdf   : > { %170 = vst [vmem:[%s165_s26] sm:$0x1] %v168_v51  ;;  %v179_v54 = vsel %vm178_vm1, %v168_v51, 1.0 }
  0xe0   : > { %175 = vst [vmem:[%s172_s29] sm:$0x1] %v173_v52  ;;  %v220_v55 = vsel %vm219_vm15, %v179_v54, 1.0  ;;  %v192_v56 = vsel %vm191_vm0, %v179_v54, 1.0 }
  0xe1   : > { %176 = vst [vmem:[%s171_s28] sm:$0x1] %v174_v53  ;;  %600 = vrcp.f32 %v220_v55  ;;  %v232_v62 = vand.u32 2147483648, %v220_v55  ;;  %v230_v1 = vand.u32 2147483647, %v220_v55  ;;  %v204_v2 = vand.u32 2147483648, %v192_v56 }
  0xe2   : > { %602 = vrcp.f32 %v192_v56  ;;  %v202_v6 = vand.u32 2147483647, %v192_v56  ;;  %vm226_vm4 = vweird.f32 %v220_v55  ;;  %vm198_vm6 = vweird.f32 %v192_v56 }
  0xe3   : > { %v233_v8 = vor.u32 1.1754944e-38, %v232_v62  ;;  %vm231_vm7 = vcmp.eq.f32.partialorder %v230_v1, 8.507059e+37  ;;  %v205_v13 = vor.u32 1.1754944e-38, %v204_v2 }
  0xe4   : > { %vm203_vm10 = vcmp.eq.f32.partialorder %v202_v6, 8.507059e+37  ;;  %v295_v12 = vld [vmem:[#allocation2] sm:$0x1] (%p87_p3) }
  0xe5   :  { %298 = vst [vmem:[#allocation3] sm:$0x1] (%p87_p3), %v295_v12 }
  0xe6   : > { %v216_v14 = vld [vmem:[#allocation1 + $0x8] sm:$0xff]  ;;  %v188_v18 = vld [vmem:[#allocation1] sm:$0xff] }
  0xe7   : > { %v601_v57 = vpop.eup %600 }
  0xe8   : > { %v603_v58 = vpop.eup %602  ;;  %v222_v59 = vmul.f32 %v601_v57, %v220_v55  ;;  %vm227_vm2 = vweird.f32 %v601_v57  ;;  %v243_v29 = vld [vmem:[#allocation8] sm:$0xff] (%p87_p3)  ;;  %v245_v30 = vld [vmem:[#allocation8 + $0x8] sm:$0xff] (%p87_p3) }
  0xe9   : > { %v194_v60 = vmul.f32 %v603_v58, %v192_v56  ;;  %vm199_vm3 = vweird.f32 %v603_v58  ;;  %vm228_vm5 = vmor %vm226_vm4, %vm227_vm2 }
  0xea   : > { %v223_v61 = vsub.f32 1.0, %v222_v59  ;;  %vm200_vm8 = vmor %vm198_vm6, %vm199_vm3 }
  0xeb   : > { %v195_v63 = vsub.f32 1.0, %v194_v60 }
  0xec   : > { %v224_v0 = vmul.f32 %v601_v57, %v223_v61 }
  0xed   : > { %v196_v5 = vmul.f32 %v603_v58, %v195_v63 }
  0xee   : > { %v225_v7 = vadd.f32 %v601_v57, %v224_v0 }
  0xef   : > { %v197_v9 = vadd.f32 %v603_v58, %v196_v5 }
  0xf0   : > { %v229_v11 = vsel %vm228_vm5, %v601_v57, %v225_v7 }
  0xf1   : > { %v234_v15 = vsel %vm231_vm7, %v233_v8, %v229_v11  ;;  %v201_v16 = vsel %vm200_vm8, %v603_v58, %v197_v9 }
  0xf2   : > { %v235_v17 = vmul.f32 %v234_v15, %v216_v14  ;;  %v206_v19 = vsel %vm203_vm10, %v205_v13, %v201_v16 }
  0xf3   : > { %v207_v20 = vmul.f32 %v206_v19, %v188_v18 }
  0xf4   : > { %v237_v21 = vsel %vm236_vm9, %v235_v17, 0.0 }
  0xf5   : > { %238 = vadd.xlane.f32.xlu1 %v237_v21  ;;  %v209_v22 = vsel %vm208_vm11, %v207_v20, 0.0 }
  0xf6   : > { %210 = vadd.xlane.f32.xlu0 %v209_v22 }
 0x11f   :  { %260 = vxpose.xlu0.b32.start [1/2] (short) (narrow) (%p87_p3), %v243_v29, 8 }
 0x127   :  { %261 = vxpose.xlu0.b32.end [2/2] (short) (narrow) (%p87_p3), %v245_v30, 8 }
 0x168   : > { %v239_v23 = vpop.xlane.xlu1 %238 }
 0x169   : > { %v240_v24 = vmul.f32 %v239_v23, %v184_v10  ;;  %v211_v25 = vpop.xlane.xlu0 %210 }
 0x16a   : > { %v212_v26 = vmul.f32 %v211_v25, %v184_v10  ;;  %89 = sbr.rel (!%p87_p3) target bundleno = 29 (0x1d), region = 156 }
 0x16b   : > { %v241_v27 = vsub.f32 %v235_v17, %v240_v24 }
 0x16c   : > { %v213_v28 = vsub.f32 %v207_v20, %v212_v26 }
 0x16d   : > { %242 = vst [vmem:[#allocation1 + $0x8] sm:$0xff] %v241_v27 }
 0x16e   : > { %214 = vst [vmem:[#allocation1] sm:$0xff] %v213_v28 }
 0x1c3   :  { %v276_v31 = vpop.trf.xlu0 }
 0x1c4   :  { %292 = vst [vmem:[#allocation5] sm:$0x1] %v276_v31 }
 0x1cb   :  { %v301_v32 = vld [vmem:[#allocation5] sm:$0x1] }
 0x1cc   :  { %304 = vst [vmem:[#allocation6] sm:$0x1] %v301_v32 }
 0x1cd LB: > { %v348_v33 = vld [vmem:[%s742_s6] sm:$0xff]  ;;  %s350_s6 = scalar_lea.vmem %s742_s6, 8   ;;  %s742_s6 = sphi %s740_s6, %s350_s6   ;;  %s738_s5 = sphi %s736_s5, %s351_s5  }
 0x1ce   : > { %349 = vst [vmem:[%s738_s5] sm:$0xff] %v348_v33  ;;  %s351_s5 = scalar_lea.vmem %s738_s5, 8   ;;  %p345_p4 = scmp.gt.s32.totalorder %s350_s6, [#allocation1 + $0x8] }
 0x1cf   :  { %s368_s9 = sshll.u32 (%p345_p4), %s850_s2, 4  ;;  %s745_s10 = smov (%p345_p4), [#allocation3]   ;;  %s369_s9 = int_to_ptr.hbm [resolvable:$true] %s368_s9 }
 0x1d0   :  { %347 = sbr.rel (!%p345_p4) target bundleno = 461 (0x1cd), region = 178  ;;  %s366_s11 = sshll.u32 (%p345_p4), %s745_s10, 4  ;;  %s367_s11 = int_to_ptr.vmem [resolvable:$true] %s366_s11 }
 0x1d1   :  { %371 = dma.vmem_to_hbm [thread:$0]  (%p345_p4), %s367_s11, 16, %s369_s9, [#allocation4]  }
 0x1d2   :  { %s746_s1 = smov (%p345_p4), [#allocation6]   ;;  %s379_s15 = sshll.u32 (%p345_p4), %s851_s3, 4  ;;  %s380_s15 = int_to_ptr.hbm [resolvable:$true] %s379_s15 }
 0x1d3   :  { %s377_s12 = sshll.u32 (%p345_p4), %s746_s1, 4  ;;  %s378_s12 = int_to_ptr.vmem [resolvable:$true] %s377_s12 }
 0x1d4   :  { %382 = dma.vmem_to_hbm [thread:$0]  (%p345_p4), %s378_s12, 16, %s380_s15, [#allocation7]  }
 0x1d5   :  { %716 = dma.done.wait [#allocation4], 16  }
 0x1d6   :  { %717 = vsyncadd [#allocation4], 4294967280 }
 0x1d7   :  { %718 = dma.done.wait [#allocation7], 16  }
 0x1d8   :  { %719 = vsyncadd [#allocation7], 4294967280 }
 0x1d9   :  { %391 = vsyncpa [#allocation4], 1 }
 0x1da   :  { %392 = vsyncpa [#allocation7], 1 }

// kernel: invertible_conv1x1_resqueeze_forward.1
= control target key start
LH: loop header
LB: loop body
LE: loop exit
PB: predicated region body
PF: predicated region fallthrough
CT: control target
= control target key end

     0   :  { %vm17_vm0 = vcmask 130048   ;;  %s227_s0 = inlined_call_operand.vmem [shape: f32[2,16,256], index: 0, kind: input, shape index: {}]   ;;  %s228_s1 = inlined_call_operand.vmem [shape: f32[16,16], index: 1, kind: input, shape index: {}]   ;;  %s229_s2 = inlined_call_operand.vmem [shape: f32[2,16,256], index: 2, kind: output, shape index: {}]  }
   0x1   :  { %v140_v0 = vld [vmem:[%s227_s0 + $0x30] sm:$0xff]  ;;  %v141_v1 = vld [vmem:[%s227_s0 + $0x38] sm:$0xff]  ;;  %v138_v2 = vld [vmem:[%s227_s0 + $0x20] sm:$0xff] }
   0x2   :  { %93 = vmatpush.msra.mxu2 %v140_v0  ;;  %116 = vmatpush.msra.mxu3 %v141_v1  ;;  %v139_v3 = vld [vmem:[%s227_s0 + $0x28] sm:$0xff]  ;;  %v11_v4 = vld [vmem:[%s228_s1] sm:$0xff]  ;;  %v15_v5 = vld [vmem:[%s227_s0 + $0x10] sm:$0xff] }
   0x3   :  { %38 = vmatpush.msra.mxu0 %v15_v5  ;;  %v16_v6 = vld [vmem:[%s227_s0 + $0x18] sm:$0xff]  ;;  %v13_v7 = vld [vmem:[%s227_s0] sm:$0xff]  ;;  %v14_v8 = vld [vmem:[%s227_s0 + $0x8] sm:$0xff] }
   0x4   :  { %94 = vmatpush.msra.mxu2 %v138_v2  ;;  %117 = vmatpush.msra.mxu3 %v139_v3  ;;  %v12_v9 = vld [vmem:[%s228_s1 + $0x8] sm:$0xff] }
   0x5   :  { %142 = vmatmul.msk.f32.vlgmr.msra.gmra.mxu2 %vm17_vm0, %v11_v4  ;;  %144 = vmatmul.msk.f32.vlgmr.msra.gmra.mxu3 %vm17_vm0, %v11_v4 }
   0x6   :  { %61 = vmatpush.msra.mxu1 %v16_v6  ;;  %39 = vmatpush.msra.mxu0 %v13_v7 }
   0x7   :  { %134 = vmatmul.msk.f32.vlgmr.msra.gmra.mxu0 %vm17_vm0, %v11_v4 }
   0x8   :  { %62 = vmatpush.msra.mxu1 %v14_v8 }
   0x9   :  { %136 = vmatmul.msk.f32.vlgmr.msra.gmra.mxu1 %vm17_vm0, %v11_v4 }
   0xd   :  { %143 = vmatmul.msk.f32.gmra.mxu2 %vm17_vm0, %v12_v9  ;;  %145 = vmatmul.msk.f32.gmra.mxu3 %vm17_vm0, %v12_v9 }
   0xf   :  { %135 = vmatmul.msk.f32.gmra.mxu0 %vm17_vm0, %v12_v9 }
  0x11   :  { %137 = vmatmul.msk.f32.gmra.mxu1 %vm17_vm0, %v12_v9 }
  0x84   :  { %v41_v10 = vpop.f32.mrf.mxu0 }
  0x85   :  { %70 = vst [vmem:[%s229_s2] sm:$0xff] %v41_v10 }
  0x86   :  { %v64_v11 = vpop.f32.mrf.mxu1 }
  0x87   :  { %71 = vst [vmem:[%s229_s2 + $0x8] sm:$0xff] %v64_v11 }
  0x88   :  { %v96_v12 = vpop.f32.mrf.mxu2  ;;  %v119_v13 = vpop.f32.mrf.mxu3 }
  0x89   :  { %146 = vst [vmem:[%s229_s2 + $0x20] sm:$0xff] %v96_v12 }
  0x8a   :  { %147 = vst [vmem:[%s229_s2 + $0x28] sm:$0xff] %v119_v13 }
  0x8c   :  { %v44_v14 = vpop.f32.mrf.mxu0 }
  0x8d   :  { %72 = vst [vmem:[%s229_s2 + $0x10] sm:$0xff] %v44_v14 }
  0x8e   :  { %v67_v15 = vpop.f32.mrf.mxu1 }
  0x8f   :  { %73 = vst [vmem:[%s229_s2 + $0x18] sm:$0xff] %v67_v15 }
  0x90   :  { %v99_v16 = vpop.f32.mrf.mxu2  ;;  %v122_v17 = vpop.f32.mrf.mxu3 }
  0x91   :  { %148 = vst [vmem:[%s229_s2 + $0x30] sm:$0xff] %v99_v16 }
  0x92   :  { %149 = vst [vmem:[%s229_s2 + $0x38] sm:$0xff] %v122_v17 }

</bundles_post_ra>
